<compile_context>
chip_gen: v6e
topology: v6e:2x2x1
jax: 0.10.0
libtpu: 0.0.40
codegen_flags: <defaults>
</compile_context>

<pallas_src>
import jax
import jax.numpy as jnp
from jax.experimental import pallas as pl
from jax.experimental.pallas import tpu as pltpu


def _round_up(x: int, m: int) -> int:
    return ((x + m - 1) // m) * m


def _residual_block_kernel(graph_ref, init_ref, edge_ref, out_ref):
    # graph_ref : (Bt, S)
    # init_ref  : (Bt, c_node * S)   -- channels flattened into lanes
    # edge_ref  : (Bt, c_edge * S)
    # out_ref   : (Bt, S)
    s = graph_ref.shape[-1]
    c_node = init_ref.shape[-1] // s
    c_edge = edge_ref.shape[-1] // s

    init_flat = init_ref[...].astype(jnp.float32)
    edge_flat = edge_ref[...].astype(jnp.float32)

    # Unrolled, fully static lane-slice sum (c_node + c_edge terms, ~10 total):
    acc = init_flat[:, 0:s]
    for c in range(1, c_node):
        acc = acc + init_flat[:, c * s:(c + 1) * s]
    for c in range(c_edge):
        acc = acc + edge_flat[:, c * s:(c + 1) * s]

    residual = acc * (1.0 / float(c_node + c_edge))
    out = graph_ref[...].astype(jnp.float32) + residual
    out_ref[...] = jnp.maximum(out, 0.0).astype(out_ref.dtype)


def residual_block(graph_out, init_input, edge_state, *, block_b: int = 512):
    """Pallas implementation of Residual_Block.forward.

    graph_out  : (B, S)
    init_input : (B, c_node, S)
    edge_state : (B, c_edge, S)
    returns    : (B, S) = relu(graph_out + mean(cat(init, edge), axis=1))
    """
    B, S = graph_out.shape
    _, c_node, S1 = init_input.shape
    _, c_edge, S2 = edge_state.shape
    assert S1 == S and S2 == S, "state_dim mismatch between inputs"

    # Flatten channels into the lane dimension (free: contiguous reshape).
    init_flat = init_input.reshape(B, c_node * S)
    edge_flat = edge_state.reshape(B, c_edge * S)

    # Batch tile: multiple of 8 sublanes, capped, never larger than needed.
    bt = min(block_b, _round_up(B, 8))
    B_pad = _round_up(B, bt)
    if B_pad != B:
        pad = B_pad - B
        graph_p = jnp.pad(graph_out, ((0, pad), (0, 0)))
        init_p = jnp.pad(init_flat, ((0, pad), (0, 0)))
        edge_p = jnp.pad(edge_flat, ((0, pad), (0, 0)))
    else:
        graph_p, init_p, edge_p = graph_out, init_flat, edge_flat

    grid_spec = pltpu.PrefetchScalarGridSpec(
        num_scalar_prefetch=0,
        grid=(B_pad // bt,),
        in_specs=[
            pl.BlockSpec((bt, S), lambda b: (b, 0)),            # graph_out
            pl.BlockSpec((bt, c_node * S), lambda b: (b, 0)),   # init (flattened)
            pl.BlockSpec((bt, c_edge * S), lambda b: (b, 0)),   # edge (flattened)
        ],
        out_specs=pl.BlockSpec((bt, S), lambda b: (b, 0)),
    )

    out = pl.pallas_call(
        _residual_block_kernel,
        out_shape=jax.ShapeDtypeStruct((B_pad, S), graph_out.dtype),
        grid_spec=grid_spec,
        compiler_params=pltpu.CompilerParams(
            dimension_semantics=("parallel",),
        ),
    )(graph_p, init_p, edge_p)

    return out[:B] if B_pad != B else out


def residual_block_ref(graph_out, init_input, edge_state):
    """Pure-JAX reference matching the PyTorch forward."""
    feat_input = jnp.concatenate((init_input, edge_state), axis=1)
    residual = jnp.mean(feat_input, axis=1)
    return jax.nn.relu(graph_out + residual)


if __name__ == "__main__":
    # Small deterministic shapes consistent with the module:
    #   state_dim=32, node_state_dim=4, edge_state_dim=6, batch=2
    B, state_dim, node_state_dim, edge_state_dim = 2, 32, 4, 6

    key = jax.random.PRNGKey(0)
    k1, k2, k3 = jax.random.split(key, 3)
    graph_out = jax.random.normal(k1, (B, state_dim), dtype=jnp.float32)
    init_input = jax.random.normal(k2, (B, node_state_dim, state_dim), dtype=jnp.float32)
    edge_state = jax.random.normal(k3, (B, edge_state_dim, state_dim), dtype=jnp.float32)

    out = residual_block(graph_out, init_input, edge_state)
    out = jax.block_until_ready(out)
    ref = residual_block_ref(graph_out, init_input, edge_state)
    assert out.shape == ref.shape == (B, state_dim)
    assert jnp.allclose(out, ref, atol=1e-5, rtol=1e-5), "mismatch vs reference (small B)"

    # Second case: exercises multi-step grid + ragged-tail padding path (still small).
    B2 = 19
    k4, k5, k6 = jax.random.split(jax.random.PRNGKey(0), 3)
    graph2 = jax.random.normal(k4, (B2, state_dim), dtype=jnp.float32)
    init2 = jax.random.normal(k5, (B2, node_state_dim, state_dim), dtype=jnp.float32)
    edge2 = jax.random.normal(k6, (B2, edge_state_dim, state_dim), dtype=jnp.float32)
    out2 = jax.block_until_ready(residual_block(graph2, init2, edge2, block_b=8))
    ref2 = residual_block_ref(graph2, init2, edge2)
    assert out2.shape == ref2.shape == (B2, state_dim)
    assert jnp.allclose(out2, ref2, atol=1e-5, rtol=1e-5), "mismatch vs reference (tail case)"

    print("KERNEL_OK")
</pallas_src>

<mosaic_0001>
module attributes {stable_mosaic.version = 11 : i64} {
  func.func @_residual_block_kernel(%arg0: i32, %arg1: memref<8x32xf32, #tpu.memory_space<vmem>>, %arg2: memref<8x128xf32, #tpu.memory_space<vmem>>, %arg3: memref<8x192xf32, #tpu.memory_space<vmem>>, %arg4: memref<8x32xf32, #tpu.memory_space<vmem>>) attributes {dimension_semantics = [#tpu.dimension_semantics<parallel>], iteration_bounds = array<i64: 1>, scalar_prefetch = 0 : i64, scratch_operands = 0 : i64, tpu.core_type = #tpu.core_type<tc>, window_params = [{transform_indices = @transform_0, window_bounds = array<i64: 8, 32>}, {transform_indices = @transform_1, window_bounds = array<i64: 8, 128>}, {transform_indices = @transform_2, window_bounds = array<i64: 8, 192>}, {transform_indices = @transform_3, window_bounds = array<i64: 8, 32>}]} {
    %c0 = arith.constant 0 : index
    %c0_0 = arith.constant 0 : index
    %0 = vector.load %arg2[%c0, %c0_0] : memref<8x128xf32, #tpu.memory_space<vmem>>, vector<8x128xf32>
    %c0_1 = arith.constant 0 : index
    %c0_2 = arith.constant 0 : index
    %1 = vector.load %arg3[%c0_1, %c0_2] : memref<8x192xf32, #tpu.memory_space<vmem>>, vector<8x192xf32>
    %2 = vector.extract_strided_slice %0 {offsets = [0, 0], sizes = [8, 32], strides = [1, 1]} : vector<8x128xf32> to vector<8x32xf32>
    %3 = vector.extract_strided_slice %0 {offsets = [0, 32], sizes = [8, 32], strides = [1, 1]} : vector<8x128xf32> to vector<8x32xf32>
    %4 = arith.addf %2, %3 : vector<8x32xf32>
    %5 = vector.extract_strided_slice %0 {offsets = [0, 64], sizes = [8, 32], strides = [1, 1]} : vector<8x128xf32> to vector<8x32xf32>
    %6 = arith.addf %4, %5 : vector<8x32xf32>
    %7 = vector.extract_strided_slice %0 {offsets = [0, 96], sizes = [8, 32], strides = [1, 1]} : vector<8x128xf32> to vector<8x32xf32>
    %8 = arith.addf %6, %7 : vector<8x32xf32>
    %9 = vector.extract_strided_slice %1 {offsets = [0, 0], sizes = [8, 32], strides = [1, 1]} : vector<8x192xf32> to vector<8x32xf32>
    %10 = arith.addf %8, %9 : vector<8x32xf32>
    %11 = vector.extract_strided_slice %1 {offsets = [0, 32], sizes = [8, 32], strides = [1, 1]} : vector<8x192xf32> to vector<8x32xf32>
    %12 = arith.addf %10, %11 : vector<8x32xf32>
    %13 = vector.extract_strided_slice %1 {offsets = [0, 64], sizes = [8, 32], strides = [1, 1]} : vector<8x192xf32> to vector<8x32xf32>
    %14 = arith.addf %12, %13 : vector<8x32xf32>
    %15 = vector.extract_strided_slice %1 {offsets = [0, 96], sizes = [8, 32], strides = [1, 1]} : vector<8x192xf32> to vector<8x32xf32>
    %16 = arith.addf %14, %15 : vector<8x32xf32>
    %17 = vector.extract_strided_slice %1 {offsets = [0, 128], sizes = [8, 32], strides = [1, 1]} : vector<8x192xf32> to vector<8x32xf32>
    %18 = arith.addf %16, %17 : vector<8x32xf32>
    %19 = vector.extract_strided_slice %1 {offsets = [0, 160], sizes = [8, 32], strides = [1, 1]} : vector<8x192xf32> to vector<8x32xf32>
    %20 = arith.addf %18, %19 : vector<8x32xf32>
    %cst = arith.constant 1.000000e-01 : f32
    %21 = vector.broadcast %cst : f32 to vector<8x32xf32>
    %22 = arith.mulf %20, %21 : vector<8x32xf32>
    %c0_3 = arith.constant 0 : index
    %c0_4 = arith.constant 0 : index
    %23 = vector.load %arg1[%c0_3, %c0_4] : memref<8x32xf32, #tpu.memory_space<vmem>>, vector<8x32xf32>
    %24 = arith.addf %23, %22 : vector<8x32xf32>
    %cst_5 = arith.constant 0.000000e+00 : f32
    %25 = vector.broadcast %cst_5 : f32 to vector<8x32xf32>
    %26 = arith.maximumf %24, %25 : vector<8x32xf32>
    %c0_6 = arith.constant 0 : index
    %c0_7 = arith.constant 0 : index
    %27 = vector.load %arg4[%c0_6, %c0_7] : memref<8x32xf32, #tpu.memory_space<vmem>>, vector<8x32xf32>
    tpu.vector_store %arg4[%c0_6, %c0_7], %26 {strides = array<i32>} : memref<8x32xf32, #tpu.memory_space<vmem>>, vector<8x32xf32>,
    return
  }
  func.func @transform_0(%arg0: i32) -> (i32, i32) {
    %c0_i32 = arith.constant 0 : i32
    %c0_i32_0 = arith.constant 0 : i32
    return %arg0, %c0_i32 : i32, i32
  }
  func.func @transform_1(%arg0: i32) -> (i32, i32) {
    %c0_i32 = arith.constant 0 : i32
    %c0_i32_0 = arith.constant 0 : i32
    return %arg0, %c0_i32 : i32, i32
  }
  func.func @transform_2(%arg0: i32) -> (i32, i32) {
    %c0_i32 = arith.constant 0 : i32
    %c0_i32_0 = arith.constant 0 : i32
    return %arg0, %c0_i32 : i32, i32
  }
  func.func @transform_3(%arg0: i32) -> (i32, i32) {
    %c0_i32 = arith.constant 0 : i32
    %c0_i32_0 = arith.constant 0 : i32
    return %arg0, %c0_i32 : i32, i32
  }
}

</mosaic_0001>

<bundles_post_ra>
// kernel: tpu_custom_call.1
= control target key start
LH: loop header
LB: loop body
LE: loop exit
PB: predicated region body
PF: predicated region fallthrough
CT: control target
= control target key end

     0   :  { %8 = vsyncpa [#allocation3], 0  ;;  %s240_s0 = inlined_call_operand.hbm [shape: f32[8,32], index: 0, kind: input, shape index: {}]   ;;  %s241_s1 = inlined_call_operand.hbm [shape: f32[8,128], index: 1, kind: input, shape index: {}]   ;;  %s242_s2 = inlined_call_operand.hbm [shape: f32[8,192], index: 2, kind: input, shape index: {}]   ;;  %s243_s3 = inlined_call_operand.hbm [shape: f32[8,32], index: 3, kind: output, shape index: {}]  }
   0x1   :  { %9 = vsyncpa [#allocation6], 0 }
   0x2   :  { %10 = vsyncpa [#allocation4], 0  ;;  %s201_s12 = smov [#allocation5]   ;;  %s202_s14 = smov [#allocation2]  }
   0x3   :  { %s27_s13 = sshll.u32 %s201_s12, 4  ;;  %s17_s15 = sshll.u32 %s202_s14, 4  ;;  %s28_s13 = int_to_ptr.vmem [resolvable:$true] %s27_s13  ;;  %s18_s15 = int_to_ptr.vmem [resolvable:$true] %s17_s15 }
   0x4   :  { %s123_s16 = scalar_lea.vmem %s28_s13, 128  ;;  %p128_p1 = scmp.lt.s32.totalorder %s28_s13, %s28_s13 }
   0x5   :  { %p124_p0 = scmp.ne.s32.totalorder %s28_s13, %s123_s16  ;;  %p129_p2 = scmp.lt.s32.totalorder %s123_s16, %s123_s16 }
   0x7   :  { %p130_p3 = por %p129_p2, %p128_p1 }
   0x9   :  { %p131_p4 = pnand %p130_p3, %p124_p0 }
   0xb   :  { %134 = shalt.err (!%p131_p4)
}
   0xc   :  { %30 = dma.hbm_to_vmem [thread:$0]  %s241_s1, 128, %s28_s13, [#allocation6]  }
   0xd   :  { %s143_s19 = scalar_lea.vmem %s18_s15, 128  ;;  %p148_p6 = scmp.lt.s32.totalorder %s18_s15, %s18_s15 }
   0xe   :  { %p144_p5 = scmp.ne.s32.totalorder %s18_s15, %s143_s19  ;;  %p149_p7 = scmp.lt.s32.totalorder %s143_s19, %s143_s19 }
  0x10   :  { %p150_p8 = por %p149_p7, %p148_p6 }
  0x12   :  { %p151_p9 = pnand %p150_p8, %p144_p5 }
  0x14   :  { %154 = shalt.err (!%p151_p9)
}
  0x15   :  { %20 = dma.hbm_to_vmem [thread:$0]  %s240_s0, 128, %s18_s15, [#allocation3]  }
  0x16   :  { %s203_s22 = smov [#allocation7]  }
  0x17   :  { %s37_s23 = sshll.u32 %s203_s22, 4  ;;  %s38_s23 = int_to_ptr.vmem [resolvable:$true] %s37_s23 }
  0x18   :  { %s163_s24 = scalar_lea.vmem %s38_s23, 256  ;;  %p168_p11 = scmp.lt.s32.totalorder %s38_s23, %s38_s23 }
  0x19   :  { %p164_p10 = scmp.ne.s32.totalorder %s38_s23, %s163_s24  ;;  %p169_p12 = scmp.lt.s32.totalorder %s163_s24, %s163_s24 }
  0x1b   :  { %p170_p13 = por %p169_p12, %p168_p11 }
  0x1d   :  { %p171_p0 = pnand %p170_p13, %p164_p10 }
  0x1f   :  { %174 = shalt.err (!%p171_p0)
}
  0x20   :  { %40 = dma.hbm_to_vmem [thread:$0]  %s242_s2, 256, %s38_s23, [#allocation6]  }
  0x21   :  { %195 = dma.done.wait [#allocation3], 128  }
  0x22   :  { %196 = vsyncadd [#allocation3], 4294967168 }
  0x23   :  { %197 = dma.done.wait [#allocation6], 384  }
  0x24   :  { %198 = vsyncadd [#allocation6], 4294966912  ;;  %v50_v0 = vld [vmem:[#allocation5] sm:$0xff]  ;;  %s204_s0 = smov 96   ;;  %s205_s26 = smov 32   ;;  %v51_v1 = vld [vmem:[#allocation7] sm:$0xff] }
  0x25   :  { %54 = vrot.lane.b32.xlu0 %v50_v0, %s204_s0  ;;  %62 = vrot.lane.b32.xlu1 %v50_v0, %s205_s26  ;;  %s206_s27 = smov 64   ;;  %v52_v2 = vld [vmem:[#allocation7 + $0x8] sm:$0xff]  ;;  %v87_v19 = vld [vmem:[#allocation2] sm:$0xff]  ;;  %s207_s2 = smov [#allocation8]   ;;  %vm90_vm0 = vcmask 261120  }
  0x26   :  { %s98_s28 = sshll.u32 %s207_s2, 4  ;;  %s99_s28 = int_to_ptr.vmem [resolvable:$true] %s98_s28 }
  0x27   :  { %s175_s29 = scalar_lea.vmem %s99_s28, 128  ;;  %p180_p2 = scmp.lt.s32.totalorder %s99_s28, %s99_s28 }
  0x28   :  { %p176_p1 = scmp.ne.s32.totalorder %s99_s28, %s175_s29  ;;  %p181_p3 = scmp.lt.s32.totalorder %s175_s29, %s175_s29 }
  0x29   :  { %58 = vrot.lane.b32.xlu0 %v50_v0, %s206_s27  ;;  %68 = vrot.lane.b32.xlu1 %v51_v1, %s204_s0 }
  0x2a   :  { %p182_p4 = por %p181_p3, %p180_p2 }
  0x2c   :  { %p183_p5 = pnand %p182_p4, %p176_p1 }
  0x2d   :  { %72 = vrot.lane.b32.xlu0 %v51_v1, %s206_s27  ;;  %76 = vrot.lane.b32.xlu1 %v51_v1, %s205_s26 }
  0x31   :  { %82 = vrot.lane.b32.xlu0 %v52_v2, %s204_s0 }
  0x97   :  { %v55_v3 = vpop.permute.xlu0 %54  ;;  %v63_v4 = vpop.permute.xlu1 %62 }
  0x98   :  { %v57_v5 = vadd.f32 %v55_v3, %v50_v0 }
  0x9b   :  { %v59_v6 = vpop.permute.xlu0 %58  ;;  %v69_v8 = vpop.permute.xlu1 %68 }
  0x9c   :  { %v61_v7 = vadd.f32 %v59_v6, %v57_v5 }
  0x9e   :  { %v65_v9 = vadd.f32 %v63_v4, %v61_v7 }
  0x9f   :  { %v73_v11 = vpop.permute.xlu0 %72  ;;  %v77_v13 = vpop.permute.xlu1 %76 }
  0xa0   :  { %v66_v10 = vadd.f32 %v65_v9, %v51_v1 }
  0xa2   :  { %v71_v12 = vadd.f32 %v69_v8, %v66_v10 }
  0xa3   :  { %v83_v16 = vpop.permute.xlu0 %82 }
  0xa4   :  { %v75_v14 = vadd.f32 %v73_v11, %v71_v12 }
  0xa6   :  { %v79_v15 = vadd.f32 %v77_v13, %v75_v14 }
  0xa8   :  { %v80_v17 = vadd.f32 %v79_v15, %v52_v2 }
  0xaa   :  { %v85_v18 = vadd.f32 %v83_v16, %v80_v17 }
  0xac   :  { %v86_v20 = vmul.f32 0.1, %v85_v18 }
  0xae   :  { %v88_v21 = vadd.f32 %v87_v19, %v86_v20 }
  0xb0   :  { %v89_v22 = vmax.f32 %v88_v21, 0.0 }
  0xb2   :  { %91 = vst.msk [vmem:[#allocation8] sm:$0xff] %vm90_vm0, %v89_v22 }
  0xb3   :  { %186 = shalt.err (!%p183_p5)
}
  0xb4   :  { %101 = dma.vmem_to_hbm [thread:$0]  %s99_s28, 128, %s243_s3, [#allocation4]  }
  0xb5   :  { %199 = dma.done.wait [#allocation4], 128  }
  0xb6   :  { %200 = vsyncadd [#allocation4], 4294967168 }
  0xb7   :  { %105 = vsyncpa [#allocation3], 1 }
  0xb8   :  { %106 = vsyncpa [#allocation6], 1 }
  0xb9   :  { %107 = vsyncpa [#allocation4], 1 }

</bundles_post_ra>
